<compile_context>
chip_gen: v5e
topology: v5e:2x2
jax: 0.10.0
libtpu: 0.0.40
codegen_flags: <defaults>
</compile_context>

<pallas_src>
import math

import jax
import jax.numpy as jnp
from jax import lax
from jax.experimental import pallas as pl
from jax.experimental.pallas import tpu as pltpu


def _round_up(x, m):
    return ((x + m - 1) // m) * m


def _cdiv(a, b):
    return (a + b - 1) // b


# ---------------------------------------------------------------------------
# Kernels
# ---------------------------------------------------------------------------

def _linear_kernel_f32(x_ref, w_ref, b_ref, o_ref):
    """f32 output: accumulate directly into the resident output block.

    x_ref: (tm, tk)   w_ref: (tn, tk)  (PyTorch (N, K) layout, no transpose)
    b_ref: (1, tn)    o_ref: (tm, tn) float32 (resident across the k axis)
    """
    @pl.when(pl.program_id(2) == 0)
    def _init():
        o_ref[...] = jnp.broadcast_to(b_ref[...], o_ref.shape)

    o_ref[...] += lax.dot_general(
        x_ref[...], w_ref[...],
        dimension_numbers=(((1,), (1,)), ((), ())),   # contract K of x with K of W
        preferred_element_type=jnp.float32,
    )


def _linear_kernel_acc(x_ref, w_ref, b_ref, o_ref, acc_ref):
    """Low-precision output: accumulate in an f32 VMEM scratch, cast at the end."""
    @pl.when(pl.program_id(2) == 0)
    def _init():
        acc_ref[...] = jnp.zeros_like(acc_ref)

    acc_ref[...] += lax.dot_general(
        x_ref[...], w_ref[...],
        dimension_numbers=(((1,), (1,)), ((), ())),
        preferred_element_type=jnp.float32,
    )

    @pl.when(pl.program_id(2) == pl.num_programs(2) - 1)
    def _finalize():
        o_ref[...] = (acc_ref[...] + b_ref[...]).astype(o_ref.dtype)


# ---------------------------------------------------------------------------
# Wrapper
# ---------------------------------------------------------------------------

def _vmem_limit_bytes():
    """~3/4 of physical VMEM, capped at 96 MiB (so ~48 MiB on v7x's 64 MiB)."""
    cap = 128 * 1024 * 1024
    try:
        info = pltpu.get_tpu_info()
        cap = int(getattr(info, "vmem_capacity_bytes", cap))
    except Exception:
        pass
    return int(min(96 * 1024 * 1024, (cap * 3) // 4))


def my_linear(x, weight, bias=None, *, tm=1024, tn=1024, tk=512,
              allow_xla_fast_path=True):
    """Pallas equivalent of torch.nn.functional.linear(x, weight, bias).

    x:      (..., in_features)
    weight: (out_features, in_features)   -- PyTorch layout, used as-is
    bias:   (out_features,) or None
    returns (..., out_features)
    """
    *lead, K = x.shape
    N, K_w = weight.shape
    assert K == K_w, "in_features mismatch"
    M = math.prod(lead) if lead else 1

    out_dtype = x.dtype
    x2d = x.reshape(M, K)

    # Small-problem fast path: pallas_call fixed cost dwarfs tiny matmuls.
    if allow_xla_fast_path and (M * N * K) < (256 * 256 * 256):
        y = lax.dot_general(x2d, weight, (((1,), (1,)), ((), ())),
                            preferred_element_type=jnp.float32)
        if bias is not None:
            y = y + bias.astype(jnp.float32)
        return y.astype(out_dtype).reshape(*lead, N)

    # ---- tile selection ---------------------------------------------------
    itemsize = jnp.dtype(out_dtype).itemsize
    sublane = {4: 8, 2: 16, 1: 32}.get(itemsize, 8)

    # Clamp tiles to the (padded) problem size, keeping MXU-friendly alignment.
    tm = min(tm, _round_up(M, sublane))
    tn = min(tn, _round_up(N, 128))
    tk = min(tk, _round_up(K, 128))

    # Megacore occupancy: keep >= 2 blocks across the two "parallel" axes when
    # the problem allows, so both TensorCores on v7x get work.
    while _cdiv(M, tm) * _cdiv(N, tn) < 2:
        if tn >= 512 and tn % 256 == 0 and N > tn // 2:
            tn //= 2
        elif tm >= 512 and tm % 256 == 0 and M > tm // 2:
            tm //= 2
        else:
            break

    Mp = _round_up(M, tm)
    Np = _round_up(N, tn)
    Kp = _round_up(K, tk)

    # Zero-pad only when needed (extra K rows/cols contribute 0 to the dot).
    x_p = x2d if (Mp == M and Kp == K) else jnp.pad(
        x2d, ((0, Mp - M), (0, Kp - K)))
    w_p = weight if (Np == N and Kp == K) else jnp.pad(
        weight, ((0, Np - N), (0, Kp - K)))

    b = bias if bias is not None else jnp.zeros((N,), out_dtype)
    b_p = b.astype(jnp.float32)
    if Np != N:
        b_p = jnp.pad(b_p, (0, Np - N))
    b_p = b_p.reshape(1, Np)

    grid = (Mp // tm, Np // tn, Kp // tk)

    use_resident_acc = (jnp.dtype(out_dtype) == jnp.dtype(jnp.float32))
    kernel = _linear_kernel_f32 if use_resident_acc else _linear_kernel_acc
    scratch = [] if use_resident_acc else [pltpu.VMEM((tm, tn), jnp.float32)]

    out_p = pl.pallas_call(
        kernel,
        out_shape=jax.ShapeDtypeStruct((Mp, Np), out_dtype),
        grid_spec=pltpu.PrefetchScalarGridSpec(
            num_scalar_prefetch=0,
            grid=grid,
            in_specs=[
                pl.BlockSpec((tm, tk), lambda i, j, k: (i, k)),   # x (M, K)
                pl.BlockSpec((tn, tk), lambda i, j, k: (j, k)),   # W (N, K), as-is
                pl.BlockSpec((1, tn), lambda i, j, k: (0, j)),    # bias
            ],
            out_specs=pl.BlockSpec((tm, tn), lambda i, j, k: (i, j)),
            scratch_shapes=scratch,
        ),
        compiler_params=pltpu.CompilerParams(
            dimension_semantics=("parallel", "parallel", "arbitrary"),
            vmem_limit_bytes=_vmem_limit_bytes(),
        ),
    )(x_p, w_p, b_p)

    out = out_p if (Mp == M and Np == N) else out_p[:M, :N]
    return out.reshape(*lead, N)


def _reference(x, weight, bias):
    y = jnp.einsum('...k,nk->...n',
                   x.astype(jnp.float32), weight.astype(jnp.float32))
    if bias is not None:
        y = y + bias.astype(jnp.float32)
    return y.astype(x.dtype)


if __name__ == "__main__":
    key = jax.random.PRNGKey(0)
    k_x, k_w, k_x2, k_w2 = jax.random.split(key, 4)

    # ---- Test 1: small shapes matching the module spec (f32, resident-acc) ---
    batch, seq = 2, 8
    in_features, out_features = 32, 16

    x = jax.random.normal(k_x, (batch, seq, in_features), dtype=jnp.float32)
    # Parameter init mirroring MyLinear.reset_parameters():
    #   weight ~ kaiming_uniform(a=sqrt(5)), bias = -3 (constant)
    w_bound = math.sqrt(6.0 / ((1.0 + 5.0) * in_features))
    weight = jax.random.uniform(k_w, (out_features, in_features), jnp.float32,
                                -w_bound, w_bound)
    bias = jnp.full((out_features,), -3.0, dtype=jnp.float32)

    y = my_linear(x, weight, bias, allow_xla_fast_path=False)  # force Pallas path
    jax.block_until_ready(y)
    y_ref = _reference(x, weight, bias)
    assert y.shape == (batch, seq, out_features)
    assert jnp.allclose(y, y_ref, atol=1e-4, rtol=1e-4)

    # ---- Test 2: larger shape exercising multi-block M grid + K reduction ----
    B2, S2, K2, N2 = 4, 384, 768, 1024
    x2 = jax.random.normal(k_x2, (B2, S2, K2), dtype=jnp.float32)
    w2_bound = math.sqrt(6.0 / ((1.0 + 5.0) * K2))
    w2 = jax.random.uniform(k_w2, (N2, K2), jnp.float32, -w2_bound, w2_bound)
    b2 = jnp.full((N2,), -3.0, dtype=jnp.float32)

    y2 = my_linear(x2, w2, b2, allow_xla_fast_path=False)
    jax.block_until_ready(y2)
    y2_ref = _reference(x2, w2, b2)
    assert y2.shape == (B2, S2, N2)
    assert jnp.allclose(y2, y2_ref, atol=1e-3, rtol=1e-3)

    # ---- Test 3: bf16 path (f32 VMEM scratch accumulator kernel) -------------
    xb = x.astype(jnp.bfloat16)
    wb = weight.astype(jnp.bfloat16)
    bb = bias.astype(jnp.bfloat16)
    yb = my_linear(xb, wb, bb, allow_xla_fast_path=False)
    jax.block_until_ready(yb)
    yb_ref = _reference(xb, wb, bb)
    assert yb.dtype == jnp.bfloat16
    assert jnp.allclose(yb.astype(jnp.float32), yb_ref.astype(jnp.float32),
                        atol=5e-2, rtol=5e-2)

    print("KERNEL_OK")
</pallas_src>

<mosaic_0001>
module attributes {stable_mosaic.version = 11 : i64} {
  func.func @_linear_kernel_f32(%arg0: i32, %arg1: i32, %arg2: i32, %arg3: memref<16x128xf32, #tpu.memory_space<vmem>>, %arg4: memref<128x128xf32, #tpu.memory_space<vmem>>, %arg5: memref<1x128xf32, #tpu.memory_space<vmem>>, %arg6: memref<16x128xf32, #tpu.memory_space<vmem>>) attributes {dimension_semantics = [#tpu.dimension_semantics<parallel>, #tpu.dimension_semantics<parallel>, #tpu.dimension_semantics<arbitrary>], iteration_bounds = array<i64: 1, 1, 1>, scalar_prefetch = 0 : i64, scratch_operands = 0 : i64, tpu.core_type = #tpu.core_type<tc>, window_params = [{transform_indices = @transform_0, window_bounds = array<i64: 16, 128>}, {transform_indices = @transform_1, window_bounds = array<i64: 128, 128>}, {transform_indices = @transform_2, window_bounds = array<i64: 1, 128>}, {transform_indices = @transform_3, window_bounds = array<i64: 16, 128>}]} {
    %c0_i32 = arith.constant 0 : i32
    %0 = arith.cmpi eq, %arg2, %c0_i32 : i32
    %1 = arith.extui %0 : i1 to i32
    %c0_i32_0 = arith.constant 0 : i32
    %2 = arith.cmpi ne, %1, %c0_i32_0 : i32
    scf.if %2 {
      %c0_8 = arith.constant 0 : index
      %c0_9 = arith.constant 0 : index
      %9 = vector.load %arg5[%c0_8, %c0_9] : memref<1x128xf32, #tpu.memory_space<vmem>>, vector<1x128xf32>
      %10 = vector.shape_cast %9 : vector<1x128xf32> to vector<1x128xf32>
      %11 = vector.broadcast %10 : vector<1x128xf32> to vector<16x128xf32>
      %c0_10 = arith.constant 0 : index
      %c0_11 = arith.constant 0 : index
      %12 = vector.load %arg6[%c0_10, %c0_11] : memref<16x128xf32, #tpu.memory_space<vmem>>, vector<16x128xf32>
      tpu.vector_store %arg6[%c0_10, %c0_11], %11 {strides = array<i32>} : memref<16x128xf32, #tpu.memory_space<vmem>>, vector<16x128xf32>,
    } else {
    }
    %c0 = arith.constant 0 : index
    %c0_1 = arith.constant 0 : index
    %3 = vector.load %arg6[%c0, %c0_1] : memref<16x128xf32, #tpu.memory_space<vmem>>, vector<16x128xf32>
    %c0_2 = arith.constant 0 : index
    %c0_3 = arith.constant 0 : index
    %4 = vector.load %arg3[%c0_2, %c0_3] : memref<16x128xf32, #tpu.memory_space<vmem>>, vector<16x128xf32>
    %c0_4 = arith.constant 0 : index
    %c0_5 = arith.constant 0 : index
    %5 = vector.load %arg4[%c0_4, %c0_5] : memref<128x128xf32, #tpu.memory_space<vmem>>, vector<128x128xf32>
    %cst = arith.constant dense<0.000000e+00> : vector<16x128xf32>
    %6 = tpu.matmul %4, %5, %cst {dimension_numbers = #tpu.dot_dimension_numbers<[1], [1], [0], [0], [0, 0, 1, 0], [], []>} : vector<16x128xf32>, vector<128x128xf32>, vector<16x128xf32> -> vector<16x128xf32>
    %7 = arith.addf %3, %6 : vector<16x128xf32>
    %c0_6 = arith.constant 0 : index
    %c0_7 = arith.constant 0 : index
    %8 = vector.load %arg6[%c0_6, %c0_7] : memref<16x128xf32, #tpu.memory_space<vmem>>, vector<16x128xf32>
    tpu.vector_store %arg6[%c0_6, %c0_7], %7 {strides = array<i32>} : memref<16x128xf32, #tpu.memory_space<vmem>>, vector<16x128xf32>,
    return
  }
  func.func @transform_0(%arg0: i32, %arg1: i32, %arg2: i32) -> (i32, i32) {
    %c0_i32 = arith.constant 0 : i32
    return %arg0, %arg2 : i32, i32
  }
  func.func @transform_1(%arg0: i32, %arg1: i32, %arg2: i32) -> (i32, i32) {
    %c0_i32 = arith.constant 0 : i32
    return %arg1, %arg2 : i32, i32
  }
  func.func @transform_2(%arg0: i32, %arg1: i32, %arg2: i32) -> (i32, i32) {
    %c0_i32 = arith.constant 0 : i32
    %c0_i32_0 = arith.constant 0 : i32
    return %c0_i32, %arg1 : i32, i32
  }
  func.func @transform_3(%arg0: i32, %arg1: i32, %arg2: i32) -> (i32, i32) {
    %c0_i32 = arith.constant 0 : i32
    return %arg0, %arg1 : i32, i32
  }
}

</mosaic_0001>

<bundles_post_ra>
// kernel: tpu_custom_call.1
= control target key start
LH: loop header
LB: loop body
LE: loop exit
PB: predicated region body
PF: predicated region fallthrough
CT: control target
= control target key end

     0   :  { %8 = vsyncpa [#allocation3], 0  ;;  %s270_s0 = inlined_call_operand.hbm [shape: f32[16,128], index: 0, kind: input, shape index: {}]   ;;  %s271_s1 = inlined_call_operand.hbm [shape: f32[128,128], index: 1, kind: input, shape index: {}]   ;;  %s272_s2 = inlined_call_operand.vmem [shape: f32[1,128], index: 2, kind: input, shape index: {}]   ;;  %s273_s3 = inlined_call_operand.hbm [shape: f32[16,128], index: 3, kind: output, shape index: {}]  }
   0x1   :  { %9 = vsyncpa [#allocation6], 0 }
   0x2   :  { %10 = vsyncpa [#allocation4], 0  ;;  %s15_s14 = sshll.u32 %s270_s0, 4  ;;  %s224_s15 = smov [#allocation2]   ;;  %s16_s14 = int_to_ptr.hbm [resolvable:$true] %s15_s14 }
   0x3   :  { %s17_s16 = sshll.u32 %s224_s15, 4  ;;  %s28_s19 = sshll.u32 %s271_s1, 4  ;;  %s18_s16 = int_to_ptr.vmem [resolvable:$true] %s17_s16  ;;  %s29_s19 = int_to_ptr.hbm [resolvable:$true] %s28_s19 }
   0x4   :  { %s225_s20 = smov 128   ;;  %s226_s21 = smov 8  }
   0x5   :  { %23 = dma.hbm_to_vmem [thread:$0]  %s16_s14, 256, %s18_s16, [#allocation3], %s225_s20, %s225_s20, %s226_s21  }
   0x6   :  { %s227_s22 = smov [#allocation5]  }
   0x7   :  { %s30_s23 = sshll.u32 %s227_s22, 4  ;;  %s31_s23 = int_to_ptr.vmem [resolvable:$true] %s30_s23 }
   0x8   :  { %36 = dma.hbm_to_vmem [thread:$0]  %s29_s19, 2048, %s31_s23, [#allocation6], %s225_s20, %s225_s20, %s226_s21  }
   0x9   :  { %218 = dma.done.wait [#allocation3], 256  }
   0xa   :  { %219 = vsyncadd [#allocation3], 4294967040 }
   0xb   :  { %220 = dma.done.wait [#allocation6], 2048  }
   0xc   :  { %221 = vsyncadd [#allocation6], 4294965248  ;;  %v76_v0 = vld [vmem:[#allocation5 + $0x78] sm:$0xff]  ;;  %v75_v1 = vld [vmem:[#allocation5 + $0x70] sm:$0xff]  ;;  %s228_s24 = smov [#allocation7]   ;;  %s110_s28 = sshll.u32 %s273_s3, 4  ;;  %s111_s28 = int_to_ptr.hbm [resolvable:$true] %s110_s28 }
   0xd   :  { %77 = vmatpush.xpose.msra.mxu0 %v76_v0  ;;  %124 = vmatpush.xpose.msra.mxu1 %v76_v0  ;;  %v74_v2 = vld [vmem:[#allocation5 + $0x68] sm:$0xff]  ;;  %v73_v3 = vld [vmem:[#allocation5 + $0x60] sm:$0xff]  ;;  %v72_v4 = vld [vmem:[#allocation5 + $0x58] sm:$0xff]  ;;  %s108_s25 = sshll.u32 %s228_s24, 4  ;;  %s109_s25 = int_to_ptr.vmem [resolvable:$true] %s108_s25 }
   0xe   :  { %v71_v5 = vld [vmem:[#allocation5 + $0x50] sm:$0xff]  ;;  %v70_v6 = vld [vmem:[#allocation5 + $0x48] sm:$0xff]  ;;  %v69_v7 = vld [vmem:[#allocation5 + $0x40] sm:$0xff] }
   0xf   :  { %v68_v8 = vld [vmem:[#allocation5 + $0x38] sm:$0xff]  ;;  %v67_v9 = vld [vmem:[#allocation5 + $0x30] sm:$0xff]  ;;  %v66_v10 = vld [vmem:[#allocation5 + $0x28] sm:$0xff] }
  0x10   :  { %v65_v11 = vld [vmem:[#allocation5 + $0x20] sm:$0xff]  ;;  %v64_v12 = vld [vmem:[#allocation5 + $0x18] sm:$0xff]  ;;  %v63_v13 = vld [vmem:[#allocation5 + $0x10] sm:$0xff] }
  0x11   :  { %78 = vmatpush.xpose.msra.mxu0 %v75_v1  ;;  %125 = vmatpush.xpose.msra.mxu1 %v75_v1  ;;  %v62_v14 = vld [vmem:[#allocation5 + $0x8] sm:$0xff]  ;;  %v61_v15 = vld [vmem:[#allocation5] sm:$0xff]  ;;  %v59_v16 = vld [vmem:[#allocation2] sm:$0xff] }
  0x12   :  { %v60_v17 = vld [vmem:[#allocation2 + $0x8] sm:$0xff]  ;;  %v145_v18 = vld [vmem:[%s272_s2] ss:$0 sm:$0xff] }
  0x15   :  { %79 = vmatpush.xpose.msra.mxu0 %v74_v2  ;;  %126 = vmatpush.xpose.msra.mxu1 %v74_v2 }
  0x19   :  { %80 = vmatpush.xpose.msra.mxu0 %v73_v3  ;;  %127 = vmatpush.xpose.msra.mxu1 %v73_v3 }
  0x1d   :  { %81 = vmatpush.xpose.msra.mxu0 %v72_v4  ;;  %128 = vmatpush.xpose.msra.mxu1 %v72_v4 }
  0x21   :  { %82 = vmatpush.xpose.msra.mxu0 %v71_v5  ;;  %129 = vmatpush.xpose.msra.mxu1 %v71_v5 }
  0x25   :  { %83 = vmatpush.xpose.msra.mxu0 %v70_v6  ;;  %130 = vmatpush.xpose.msra.mxu1 %v70_v6 }
  0x29   :  { %84 = vmatpush.xpose.msra.mxu0 %v69_v7  ;;  %131 = vmatpush.xpose.msra.mxu1 %v69_v7 }
  0x2d   :  { %85 = vmatpush.xpose.msra.mxu0 %v68_v8  ;;  %132 = vmatpush.xpose.msra.mxu1 %v68_v8 }
  0x31   :  { %86 = vmatpush.xpose.msra.mxu0 %v67_v9  ;;  %133 = vmatpush.xpose.msra.mxu1 %v67_v9 }
  0x35   :  { %87 = vmatpush.xpose.msra.mxu0 %v66_v10  ;;  %134 = vmatpush.xpose.msra.mxu1 %v66_v10 }
  0x39   :  { %88 = vmatpush.xpose.msra.mxu0 %v65_v11  ;;  %135 = vmatpush.xpose.msra.mxu1 %v65_v11 }
  0x3d   :  { %89 = vmatpush.xpose.msra.mxu0 %v64_v12  ;;  %136 = vmatpush.xpose.msra.mxu1 %v64_v12 }
  0x41   :  { %90 = vmatpush.xpose.msra.mxu0 %v63_v13  ;;  %137 = vmatpush.xpose.msra.mxu1 %v63_v13 }
  0x45   :  { %91 = vmatpush.xpose.msra.mxu0 %v62_v14  ;;  %138 = vmatpush.xpose.msra.mxu1 %v62_v14 }
  0x49   :  { %92 = vmatpush.xpose.msra.mxu0 %v61_v15  ;;  %139 = vmatpush.xpose.msra.mxu1 %v61_v15 }
  0x4c   :  { %93 = vmatmul.f32.vlgmr.msra.gmra.mxu0 %v59_v16  ;;  %96 = vmatmul.f32.vlgmr.msra.gmra.mxu1 %v60_v17 }
  0xc9   :  { %v94_v19 = vpop.f32.mrf.mxu0  ;;  %v97_v20 = vpop.f32.mrf.mxu1 }
  0xca   :  { %v100_v21 = vadd.f32 %v145_v18, %v94_v19  ;;  %v101_v22 = vadd.f32 %v145_v18, %v97_v20 }
  0xcc   :  { %102 = vst [vmem:[#allocation7] sm:$0xff] %v100_v21 }
  0xcd   :  { %103 = vst [vmem:[#allocation7 + $0x8] sm:$0xff] %v101_v22 }
  0xce   :  { %116 = dma.vmem_to_hbm [thread:$0]  %s109_s25, 256, %s111_s28, [#allocation4], %s225_s20, %s225_s20, %s226_s21  }
  0xcf   :  { %222 = dma.done.wait [#allocation4], 256  }
  0xd0   :  { %223 = vsyncadd [#allocation4], 4294967040 }
  0xd1   :  { %121 = vsyncpa [#allocation3], 1 }
  0xd2   :  { %122 = vsyncpa [#allocation6], 1 }
  0xd3   :  { %123 = vsyncpa [#allocation4], 1 }

</bundles_post_ra>
